<compile_context>
chip_gen: v7x
topology: tpu7x:2x2x1
jax: 0.10.0
libtpu: 0.0.40
codegen_flags: <defaults>
</compile_context>

<pallas_src>
import functools

import jax
import jax.numpy as jnp
from jax.experimental import pallas as pl
from jax.experimental.pallas import tpu as pltpu

HIDDEN = 64


def _round_up(x, m):
    return ((x + m - 1) // m) * m


def _mlp_kernel(e_ref, w0_ref, b0_ref, w1_ref, b1_ref, w2_ref, b2_ref, o_ref):
    # fc_E1: (TB,1) x (1,64) is a rank-1 outer product -> VPU broadcast multiply,
    # no MXU push/pop latency for a K=1 contraction.
    x = jnp.maximum(e_ref[...] * w0_ref[...] + b0_ref[...], 0.0)          # (TB, 64)
    # fc1: (TB,64) @ (64,64) + bias, ReLU  (MXU, f32 accumulate)
    x = jnp.dot(x, w1_ref[...], preferred_element_type=jnp.float32)
    x = jnp.maximum(x + b1_ref[...], 0.0)                                  # (TB, 64)
    # fc2: (TB,64) @ (64,out_dim) + bias, stored unpadded (block last-dim ==
    # full array dim, so the (8,128) rule is satisfied without padding).
    x = jnp.dot(x, w2_ref[...], preferred_element_type=jnp.float32)
    o_ref[...] = (x + b2_ref[...]).astype(o_ref.dtype)


@functools.partial(jax.jit, static_argnames=("tb",))
def mlp_model1_forward(E, params, *, tb=4096):
    """Pallas forward of MLPModel1. E: (B, 1) f32 -> (B, output_dim) f32."""
    w0, b0, w1, b1, w2, b2 = params
    B = E.shape[0]
    out_dim = w2.shape[1]

    # Batch tiling: block height is a multiple of 8 sublanes.  If the batch
    # spans >= 2 sublane groups, cap the tile so there are at least two grid
    # blocks (v7x megacore: the "parallel" axis shards across both TCs).
    b8 = _round_up(B, 8)
    if b8 >= 16:
        tb = min(tb, _round_up((b8 + 1) // 2, 8))
    else:
        tb = min(tb, b8)
    tb = max(tb, 8)

    b_pad = _round_up(B, tb)
    if b_pad != B:
        # Padded rows produce garbage (ReLU(b0) propagated) but are sliced off.
        E = jnp.pad(E, ((0, b_pad - B), (0, 0)))
    nb = b_pad // tb

    const2d = lambda i: (0, 0)  # weights/biases: same block every step -> VMEM resident

    out = pl.pallas_call(
        _mlp_kernel,
        out_shape=jax.ShapeDtypeStruct((b_pad, out_dim), jnp.float32),
        grid=(nb,),
        in_specs=[
            pl.BlockSpec((tb, 1), lambda i: (i, 0)),        # E, streamed per block
            pl.BlockSpec(w0.shape, const2d),
            pl.BlockSpec(b0.shape, const2d),
            pl.BlockSpec(w1.shape, const2d),
            pl.BlockSpec(b1.shape, const2d),
            pl.BlockSpec(w2.shape, const2d),
            pl.BlockSpec(b2.shape, const2d),
        ],
        out_specs=pl.BlockSpec((tb, out_dim), lambda i: (i, 0)),
        compiler_params=pltpu.CompilerParams(
            dimension_semantics=("parallel",),
        ),
    )(E, w0, b0, w1, b1, w2, b2)

    if b_pad != B:
        out = out[:B]
    return out


def init_params(key, output_dim):
    """Deterministic params mirroring nn.Linear shapes.
    Weights stored transposed: (in_features, out_features)."""
    k0, k1, k2, k3, k4, k5 = jax.random.split(key, 6)
    w0 = jax.random.normal(k0, (1, HIDDEN), jnp.float32) * 0.5
    b0 = jax.random.normal(k1, (1, HIDDEN), jnp.float32) * 0.1
    w1 = jax.random.normal(k2, (HIDDEN, HIDDEN), jnp.float32) * (1.0 / HIDDEN ** 0.5)
    b1 = jax.random.normal(k3, (1, HIDDEN), jnp.float32) * 0.1
    w2 = jax.random.normal(k4, (HIDDEN, output_dim), jnp.float32) * (1.0 / HIDDEN ** 0.5)
    b2 = jax.random.normal(k5, (1, output_dim), jnp.float32) * 0.1
    return (w0, b0, w1, b1, w2, b2)


def model_forward(A, B, C, D, E, F, G, H, I, params):
    # Matches MLPModel1.forward: only E is used.
    return mlp_model1_forward(E, params)


def _reference_forward(E, params):
    w0, b0, w1, b1, w2, b2 = params
    x = jnp.maximum(E @ w0 + b0, 0.0)
    x = jnp.maximum(x @ w1 + b1, 0.0)
    return x @ w2 + b2


if __name__ == "__main__":
    key = jax.random.PRNGKey(0)
    k_in, k_par = jax.random.split(key)

    batch = 8
    output_dim = 8

    # Nine inputs, as in the PyTorch forward signature; all (batch, 1).
    ks = jax.random.split(k_in, 9)
    A, B, C, D, E, F, G, H, I = [
        jax.random.normal(k, (batch, 1), jnp.float32) for k in ks
    ]

    params = init_params(k_par, output_dim)

    out = model_forward(A, B, C, D, E, F, G, H, I, params)
    out = jax.block_until_ready(out)

    ref = _reference_forward(E, params)
    assert out.shape == (batch, output_dim)
    assert jnp.allclose(out, ref, atol=1e-5, rtol=1e-5)

    # Also exercise a multi-block batch (non-multiple of the tile) to cover
    # the padded/parallel-grid path.
    E_big = jax.random.normal(jax.random.PRNGKey(7), (1000, 1), jnp.float32)
    out_big = jax.block_until_ready(mlp_model1_forward(E_big, params))
    assert out_big.shape == (1000, output_dim)
    assert jnp.allclose(out_big, _reference_forward(E_big, params), atol=1e-5, rtol=1e-5)

    print("KERNEL_OK")
</pallas_src>

<mosaic_0001>
module attributes {stable_mosaic.version = 11 : i64} {
  func.func @_mlp_kernel(%arg0: i32, %arg1: memref<8x1xf32, #tpu.memory_space<vmem>>, %arg2: memref<1x64xf32, #tpu.memory_space<vmem>>, %arg3: memref<1x64xf32, #tpu.memory_space<vmem>>, %arg4: memref<64x64xf32, #tpu.memory_space<vmem>>, %arg5: memref<1x64xf32, #tpu.memory_space<vmem>>, %arg6: memref<64x8xf32, #tpu.memory_space<vmem>>, %arg7: memref<1x8xf32, #tpu.memory_space<vmem>>, %arg8: memref<8x8xf32, #tpu.memory_space<vmem>>) attributes {dimension_semantics = [#tpu.dimension_semantics<parallel>], iteration_bounds = array<i64: 1>, scalar_prefetch = 0 : i64, scratch_operands = 0 : i64, tpu.core_type = #tpu.core_type<tc>, window_params = [{transform_indices = @transform_0, window_bounds = array<i64: 8, 1>}, {pipeline_mode = #tpu.pipeline_mode<synchronous>, transform_indices = @transform_1, window_bounds = array<i64: 1, 64>}, {pipeline_mode = #tpu.pipeline_mode<synchronous>, transform_indices = @transform_2, window_bounds = array<i64: 1, 64>}, {pipeline_mode = #tpu.pipeline_mode<synchronous>, transform_indices = @transform_3, window_bounds = array<i64: 64, 64>}, {pipeline_mode = #tpu.pipeline_mode<synchronous>, transform_indices = @transform_4, window_bounds = array<i64: 1, 64>}, {pipeline_mode = #tpu.pipeline_mode<synchronous>, transform_indices = @transform_5, window_bounds = array<i64: 64, 8>}, {pipeline_mode = #tpu.pipeline_mode<synchronous>, transform_indices = @transform_6, window_bounds = array<i64: 1, 8>}, {transform_indices = @transform_7, window_bounds = array<i64: 8, 8>}]} {
    %c0 = arith.constant 0 : index
    %c0_0 = arith.constant 0 : index
    %0 = vector.load %arg1[%c0, %c0_0] : memref<8x1xf32, #tpu.memory_space<vmem>>, vector<8x1xf32>
    %c0_1 = arith.constant 0 : index
    %c0_2 = arith.constant 0 : index
    %1 = vector.load %arg2[%c0_1, %c0_2] : memref<1x64xf32, #tpu.memory_space<vmem>>, vector<1x64xf32>
    %2 = vector.broadcast %0 : vector<8x1xf32> to vector<8x64xf32>
    %3 = vector.broadcast %1 : vector<1x64xf32> to vector<8x64xf32>
    %4 = arith.mulf %2, %3 : vector<8x64xf32>
    %c0_3 = arith.constant 0 : index
    %c0_4 = arith.constant 0 : index
    %5 = vector.load %arg3[%c0_3, %c0_4] : memref<1x64xf32, #tpu.memory_space<vmem>>, vector<1x64xf32>
    %6 = vector.broadcast %5 : vector<1x64xf32> to vector<8x64xf32>
    %7 = arith.addf %4, %6 : vector<8x64xf32>
    %cst = arith.constant 0.000000e+00 : f32
    %8 = vector.broadcast %cst : f32 to vector<8x64xf32>
    %9 = arith.maximumf %7, %8 : vector<8x64xf32>
    %c0_5 = arith.constant 0 : index
    %c0_6 = arith.constant 0 : index
    %10 = vector.load %arg4[%c0_5, %c0_6] : memref<64x64xf32, #tpu.memory_space<vmem>>, vector<64x64xf32>
    %cst_7 = arith.constant dense<0.000000e+00> : vector<8x64xf32>
    %11 = tpu.matmul %9, %10, %cst_7 {dimension_numbers = #tpu.dot_dimension_numbers<[1], [0], [0], [1], [0, 0, 1, 1], [], []>} : vector<8x64xf32>, vector<64x64xf32>, vector<8x64xf32> -> vector<8x64xf32>
    %c0_8 = arith.constant 0 : index
    %c0_9 = arith.constant 0 : index
    %12 = vector.load %arg5[%c0_8, %c0_9] : memref<1x64xf32, #tpu.memory_space<vmem>>, vector<1x64xf32>
    %13 = vector.broadcast %12 : vector<1x64xf32> to vector<8x64xf32>
    %14 = arith.addf %11, %13 : vector<8x64xf32>
    %cst_10 = arith.constant 0.000000e+00 : f32
    %15 = vector.broadcast %cst_10 : f32 to vector<8x64xf32>
    %16 = arith.maximumf %14, %15 : vector<8x64xf32>
    %c0_11 = arith.constant 0 : index
    %c0_12 = arith.constant 0 : index
    %17 = vector.load %arg6[%c0_11, %c0_12] : memref<64x8xf32, #tpu.memory_space<vmem>>, vector<64x8xf32>
    %cst_13 = arith.constant dense<0.000000e+00> : vector<8x8xf32>
    %18 = tpu.matmul %16, %17, %cst_13 {dimension_numbers = #tpu.dot_dimension_numbers<[1], [0], [0], [1], [0, 0, 1, 1], [], []>} : vector<8x64xf32>, vector<64x8xf32>, vector<8x8xf32> -> vector<8x8xf32>
    %c0_14 = arith.constant 0 : index
    %c0_15 = arith.constant 0 : index
    %19 = vector.load %arg7[%c0_14, %c0_15] : memref<1x8xf32, #tpu.memory_space<vmem>>, vector<1x8xf32>
    %20 = vector.broadcast %19 : vector<1x8xf32> to vector<8x8xf32>
    %21 = arith.addf %18, %20 : vector<8x8xf32>
    %c0_16 = arith.constant 0 : index
    %c0_17 = arith.constant 0 : index
    %22 = vector.load %arg8[%c0_16, %c0_17] : memref<8x8xf32, #tpu.memory_space<vmem>>, vector<8x8xf32>
    tpu.vector_store %arg8[%c0_16, %c0_17], %21 {strides = array<i32>} : memref<8x8xf32, #tpu.memory_space<vmem>>, vector<8x8xf32>,
    return
  }
  func.func @transform_0(%arg0: i32) -> (i32, i32) {
    %c0_i32 = arith.constant 0 : i32
    %c0_i32_0 = arith.constant 0 : i32
    return %arg0, %c0_i32 : i32, i32
  }
  func.func @transform_1(%arg0: i32) -> (i32, i32) {
    %c0_i32 = arith.constant 0 : i32
    %c0_i32_0 = arith.constant 0 : i32
    %c0_i32_1 = arith.constant 0 : i32
    return %c0_i32, %c0_i32_0 : i32, i32
  }
  func.func @transform_2(%arg0: i32) -> (i32, i32) {
    %c0_i32 = arith.constant 0 : i32
    %c0_i32_0 = arith.constant 0 : i32
    %c0_i32_1 = arith.constant 0 : i32
    return %c0_i32, %c0_i32_0 : i32, i32
  }
  func.func @transform_3(%arg0: i32) -> (i32, i32) {
    %c0_i32 = arith.constant 0 : i32
    %c0_i32_0 = arith.constant 0 : i32
    %c0_i32_1 = arith.constant 0 : i32
    return %c0_i32, %c0_i32_0 : i32, i32
  }
  func.func @transform_4(%arg0: i32) -> (i32, i32) {
    %c0_i32 = arith.constant 0 : i32
    %c0_i32_0 = arith.constant 0 : i32
    %c0_i32_1 = arith.constant 0 : i32
    return %c0_i32, %c0_i32_0 : i32, i32
  }
  func.func @transform_5(%arg0: i32) -> (i32, i32) {
    %c0_i32 = arith.constant 0 : i32
    %c0_i32_0 = arith.constant 0 : i32
    %c0_i32_1 = arith.constant 0 : i32
    return %c0_i32, %c0_i32_0 : i32, i32
  }
  func.func @transform_6(%arg0: i32) -> (i32, i32) {
    %c0_i32 = arith.constant 0 : i32
    %c0_i32_0 = arith.constant 0 : i32
    %c0_i32_1 = arith.constant 0 : i32
    return %c0_i32, %c0_i32_0 : i32, i32
  }
  func.func @transform_7(%arg0: i32) -> (i32, i32) {
    %c0_i32 = arith.constant 0 : i32
    %c0_i32_0 = arith.constant 0 : i32
    return %arg0, %c0_i32 : i32, i32
  }
}

</mosaic_0001>

<bundles_post_ra>
// kernel: mlp_model1_forward.1
= control target key start
LH: loop header
LB: loop body
LE: loop exit
PB: predicated region body
PF: predicated region fallthrough
CT: control target
= control target key end

     0   :  { %v360_v3 = vmov 0   ;;  %v361_v4 = vmov 0.0|0.0   ;;  %s480_s0 = inlined_call_operand.vmem [shape: f32[8,1], index: 0, kind: input, shape index: {}]   ;;  %s481_s1 = inlined_call_operand.vmem [shape: f32[1,64], index: 1, kind: input, shape index: {}]   ;;  %s482_s2 = inlined_call_operand.vmem [shape: f32[1,64], index: 2, kind: input, shape index: {}]   ;;  %s483_s3 = inlined_call_operand.vmem [shape: f32[64,64], index: 3, kind: input, shape index: {}]   ;;  %s484_s4 = inlined_call_operand.vmem [shape: f32[1,64], index: 4, kind: input, shape index: {}]   ;;  %s485_s5 = inlined_call_operand.vmem [shape: f32[64,8], index: 5, kind: input, shape index: {}]   ;;  %s486_s6 = inlined_call_operand.vmem [shape: f32[1,8], index: 6, kind: input, shape index: {}]   ;;  %s487_s7 = inlined_call_operand.hbm [shape: f32[8,8], index: 7, kind: output, shape index: {}]  }
   0x1   :  { %v27_v0 = vld [vmem:[%s480_s0] sm:$0xff]  ;;  %v51_v2 = vld [vmem:[%s483_s3 + $0x8] sm:$0xff]  ;;  %335 = vset.pattern.permute.xlu0 %v360_v3  ;;  %306 = vmatprep.subr.bf16.mxu0 %v361_v4  ;;  %v52_v6 = vld [vmem:[%s483_s3 + $0x10] sm:$0xff] }
   0x2   :  { %v50_v1 = vld [vmem:[%s483_s3] sm:$0xff]  ;;  %v53_v7 = vld [vmem:[%s483_s3 + $0x18] sm:$0xff]  ;;  %31 = vperm.xlu0 %335, %v27_v0   ;;  %318 = vmatprep.subr.bf16.mxu1 %v361_v4 }
   0x3   :  { %v307_v5 = vpack.c.bf16 %v51_v2, %v50_v1  ;;  %v310_v8 = vpack.c.bf16 %v53_v7, %v52_v6 }
   0x5   :  { %308 = vmatpush3.bf16.msra.mxu0 %v307_v5 }
   0x6   :  { %12 = vsyncpa [#allocation3], 0  ;;  %309 = vmatprep.subr.bf16.mxu0 %v361_v4  ;;  %v54_v9 = vld [vmem:[%s483_s3 + $0x20] sm:$0xff]  ;;  %v55_v10 = vld [vmem:[%s483_s3 + $0x28] sm:$0xff]  ;;  %vm362_vm0 = vmmov 0   ;;  %v363_v14 = vmov 0.0  }
   0x7   :  { %v313_v11 = vpack.c.bf16 %v55_v10, %v54_v9  ;;  %v56_v12 = vld [vmem:[%s483_s3 + $0x30] sm:$0xff]  ;;  %v57_v13 = vld [vmem:[%s483_s3 + $0x38] sm:$0xff]  ;;  %284 = vmatprep.mubr.msk.f32.mxu0 %vm362_vm0, %v363_v14  ;;  %v140_v15 = vld [vmem:[%s485_s5] sm:$0xff]  ;;  %303 = vmatprep.mubr.msk.f32.mxu1 %vm362_vm0, %v363_v14  ;;  %vm65_vm1 = vcmask 523264   ;;  %s364_s15 = smov [#allocation2]   ;;  %vm228_vm2 = vcmask 64512  }
   0x8   :  { %v141_v16 = vld [vmem:[%s485_s5 + $0x8] sm:$0xff]  ;;  %v142_v17 = vld [vmem:[%s485_s5 + $0x10] sm:$0xff]  ;;  %v143_v19 = vld [vmem:[%s485_s5 + $0x18] sm:$0xff]  ;;  %v316_v20 = vpack.c.bf16 %v57_v13, %v56_v12  ;;  %s236_s16 = sshll.u32 %s364_s15, 4  ;;  %s237_s16 = int_to_ptr.vmem [resolvable:$true] %s236_s16 }
   0x9   :  { %311 = vmatpush3.bf16.msra.mxu0 %v310_v8  ;;  %v319_v18 = vpack.c.bf16 %v141_v16, %v140_v15  ;;  %v322_v21 = vpack.c.bf16 %v143_v19, %v142_v17  ;;  %v144_v22 = vld [vmem:[%s485_s5 + $0x20] sm:$0xff]  ;;  %v145_v23 = vld [vmem:[%s485_s5 + $0x28] sm:$0xff]  ;;  %v146_v31 = vld [vmem:[%s485_s5 + $0x30] sm:$0xff]  ;;  %p341_p1 = scmp.lt.s32.totalorder %s237_s16, %s237_s16 }
   0xa   :  { %312 = vmatprep.subr.bf16.mxu0 %v361_v4  ;;  %v325_v24 = vpack.c.bf16 %v145_v23, %v144_v22  ;;  %v244_v25 = vld [vmem:[%s481_s1] ss:$0 sm:$0xff]  ;;  %v147_v32 = vld [vmem:[%s485_s5 + $0x38] sm:$0xff]  ;;  %s336_s5 = scalar_lea.vmem %s237_s16, 128 }
   0xb   :  { %320 = vmatpush3.bf16.msra.mxu1 %v319_v18  ;;  %v245_v26 = vld [vmem:[%s482_s2] ss:$0 sm:$0xff]  ;;  %v328_v33 = vpack.c.bf16 %v147_v32, %v146_v31  ;;  %p337_p0 = scmp.ne.s32.totalorder %s237_s16, %s336_s5  ;;  %p342_p2 = scmp.lt.s32.totalorder %s336_s5, %s336_s5 }
   0xc   :  { %321 = vmatprep.subr.bf16.mxu1 %v361_v4  ;;  %v246_v34 = vld [vmem:[%s484_s4] ss:$0 sm:$0xff] }
   0xd   :  { %314 = vmatpush3.bf16.msra.mxu0 %v313_v11  ;;  %v248_v39 = vld [vmem:[%s486_s6] ss:$0 sm:$0xff]  ;;  %p343_p3 = por %p342_p2, %p341_p1 }
   0xe   :  { %315 = vmatprep.subr.bf16.mxu0 %v361_v4 }
   0xf   :  { %323 = vmatpush3.bf16.msra.mxu1 %v322_v21  ;;  %p344_p4 = pnand %p343_p3, %p337_p0 }
  0x10   :  { %324 = vmatprep.subr.bf16.mxu1 %v361_v4 }
  0x11   :  { %317 = vmatpush3.bf16.msra.mxu0 %v316_v20 }
  0x13   :  { %326 = vmatpush3.bf16.msra.mxu1 %v325_v24 }
  0x14   :  { %327 = vmatprep.subr.bf16.mxu1 %v361_v4 }
  0x17   :  { %329 = vmatpush3.bf16.msra.mxu1 %v328_v33 }
  0x81   :  { %v32_v27 = vpop.permute.xlu0 %31 }
  0x82   :  { %v40_v28 = vmul.f32 %v244_v25, %v32_v27 }
  0x84   :  { %v48_v29 = vadd.f32 %v245_v26, %v40_v28 }
  0x86   :  { %v49_v30 = vmax.f32 %v48_v29, 0.0 }
  0x88   :  { %285 = vmatmul.mubr.msk.f32.vlgmr.msra.gmra.mrb[0].mxu0 %vm65_vm1, %v49_v30 }
 0x15b   :  { %v135_v35 = vpop.f32.mrb[0].mxu0 }
 0x15c   :  { %v136_v36 = vadd.f32 %v246_v34, %v135_v35  ;;  %v286_v37 = vpop.f32.mrb[1].mxu0 }
 0x15e   :  { %v139_v38 = vmax.f32 %v136_v36, 0.0 }
 0x160   :  { %304 = vmatmul.mubr.msk.f32.vlgmr.msra.gmra.mrb[0].mxu1 %vm65_vm1, %v139_v38 }
 0x233   :  { %v224_v40 = vpop.f32.mrb[0].mxu1 }
 0x234   :  { %v225_v41 = vadd.f32 %v248_v39, %v224_v40  ;;  %v305_v42 = vpop.f32.mrb[1].mxu1 }
 0x236   :  { %229 = vst.msk [vmem:[#allocation2] sm:$0xff] %vm228_vm2, %v225_v41 }
 0x237   :  { %347 = shalt.err (!%p344_p4)
}
 0x238   :  { %s348_s18 = scalar_lea.hbm %s487_s7, 128 }
 0x239   :  { %p349_p5 = scmp.ne.s32.totalorder %s487_s7, %s348_s18  ;;  %p352_p6 = scmp.lt.u32.totalorder %s348_s18, %s487_s7 }
 0x23b   :  { %p354_p7 = pnand %p352_p6, %p349_p5 }
 0x23d   :  { %357 = shalt.err (!%p354_p7)
}
 0x23e   :  { %239 = dma.vmem_to_hbm [thread:$0]  %s237_s16, 128, %s487_s7, [#allocation3]  }
 0x23f   :  { %358 = dma.done.wait [#allocation3], 128  }
 0x240   :  { %359 = vsyncadd [#allocation3], 4294967168 }
 0x241   :  { %243 = vsyncpa [#allocation3], 1 }

</bundles_post_ra>
